<compile_context>
chip_gen: v6e
topology: v6e:2x2x1
jax: 0.10.0
libtpu: 0.0.40
codegen_flags: <defaults>
</compile_context>

<pallas_src>
import functools

import jax
import jax.numpy as jnp
from jax.experimental import pallas as pl
from jax.experimental.pallas import tpu as pltpu


_TM_MAX = 512    # max gram row-block (rows of G produced per pass over feats)
_TK_MAX = 4096   # max H*W (reduction) tile


def _round_up(x, m):
    return ((x + m - 1) // m) * m


def _vmem_budget():
    """(planned-tile budget, vmem_limit_bytes) derived from the chip's VMEM."""
    try:
        cap = int(pltpu.get_tpu_info().vmem_capacity_bytes)
    except Exception:
        cap = 64 * 1024 * 1024          # conservative (v7x-sized) fallback
    limit = min(cap * 3 // 4, 96 * 1024 * 1024)   # headroom for internal scratch
    budget = limit * 4 // 5                        # headroom inside the limit
    return budget, limit


def _tiling(bc, hw, itemsize):
    """Pick (bc_pad, hw_pad, tm, tk, vmem_limit) for the gram kernels.

    All VMEM accounting includes the x2 double-buffer factor Pallas applies to
    every pipelined input/output block.
    """
    budget, vmem_limit = _vmem_budget()
    bc_pad = _round_up(bc, 128)
    hw_pad = _round_up(hw, 128)         # pad only to lane width, not to tk

    # Row block: as large as possible (arithmetic intensity ~ 2*tm/itemsize)
    # while (a) being a 128-multiple divisor of bc_pad, (b) keeping >= 2 row
    # blocks when bc_pad > 128 so v7x megacore has "parallel" work, and
    # (c) leaving >= half the VMEM budget for the streamed feature slab.
    tm_cap = max(128, (min(_TM_MAX, max(128, bc_pad // 2)) // 128) * 128)
    tm = 128
    for cand in range(tm_cap, 127, -128):
        resident = 4 * cand * bc_pad * 4    # 2x target + 2x gram-out blocks (f32)
        if bc_pad % cand == 0 and resident <= budget // 2:
            tm = cand
            break

    # K tile: largest 128-multiple divisor of hw_pad that fits the remaining
    # budget with the x2 double-buffered (bc_pad, tk) feature slab.
    fixed = 4 * tm * bc_pad * 4 + 2 * bc_pad * 4
    tk_cap = max(128, (budget - fixed) // (2 * bc_pad * itemsize))
    tk_cap = min(_TK_MAX, max(128, (tk_cap // 128) * 128))
    tk = 128
    for d in range(tk_cap // 128, 0, -1):
        if (hw_pad // 128) % d == 0:
            tk = 128 * d
            break

    return bc_pad, hw_pad, tm, tk, vmem_limit


# ----------------------------------------------------------------------------
# Kernels
# ----------------------------------------------------------------------------
def _gram_kernel(feat_ref, g_ref, *, inv_n, tm):
    # feat_ref: (bc_pad, tk) feature slab for this k tile.
    # g_ref:    (tm, bc_pad) resident f32 output block (accumulator).
    k = pl.program_id(1)

    @pl.when(k == 0)
    def _():
        g_ref[...] = jnp.zeros_like(g_ref)

    row0 = pl.multiple_of(pl.program_id(0) * tm, tm)
    lhs = feat_ref[pl.ds(row0, tm), :]               # row block sliced in VMEM
    g_ref[...] += jax.lax.dot_general(
        lhs, feat_ref[...],
        dimension_numbers=(((1,), (1,)), ((), ())),   # contract last dims: no .T
        preferred_element_type=jnp.float32)

    @pl.when(k == pl.num_programs(1) - 1)
    def _():
        g_ref[...] = g_ref[...] * inv_n


def _gram_mse_kernel(feat_ref, tgt_ref, g_ref, lossp_ref, *, inv_n, tm):
    # feat_ref: (bc_pad, tk), tgt_ref/g_ref: (tm, bc_pad),
    # lossp_ref: (1, bc_pad) lane-dense per-row-block partial sums of diff^2.
    k = pl.program_id(1)

    @pl.when(k == 0)
    def _():
        g_ref[...] = jnp.zeros_like(g_ref)

    row0 = pl.multiple_of(pl.program_id(0) * tm, tm)
    lhs = feat_ref[pl.ds(row0, tm), :]
    g_ref[...] += jax.lax.dot_general(
        lhs, feat_ref[...],
        dimension_numbers=(((1,), (1,)), ((), ())),
        preferred_element_type=jnp.float32)

    @pl.when(k == pl.num_programs(1) - 1)
    def _():
        g = g_ref[...] * inv_n
        g_ref[...] = g
        diff = g - tgt_ref[...].astype(jnp.float32)
        lossp_ref[...] = jnp.sum(diff * diff, axis=0, keepdims=True)


# ----------------------------------------------------------------------------
# Wrappers
# ----------------------------------------------------------------------------
def _prep(x):
    """NCHW -> zero-padded (bc_pad, hw_pad) feature matrix + tiling params."""
    b, c, h, w = x.shape
    bc, hw = b * c, h * w
    feats = x.reshape(bc, hw)
    bc_pad, hw_pad, tm, tk, vmem_limit = _tiling(bc, hw, jnp.dtype(x.dtype).itemsize)
    if (bc_pad, hw_pad) != (bc, hw):
        feats = jnp.pad(feats, ((0, bc_pad - bc), (0, hw_pad - hw)))
    n = float(bc * hw)                 # normalizer uses REAL sizes (padding is zeros)
    return feats, bc, bc_pad, hw_pad, tm, tk, n, vmem_limit


def _compiler_params(vmem_limit):
    return pltpu.CompilerParams(
        dimension_semantics=("parallel", "arbitrary"),
        vmem_limit_bytes=int(vmem_limit),
    )


def gram_pallas(x):
    """Gram matrix of an NCHW tensor.  Returns (gram[BC,BC], padded gram)."""
    feats, bc, bc_pad, hw_pad, tm, tk, n, vmem_limit = _prep(x)
    grid = (bc_pad // tm, hw_pad // tk)
    g_pad = pl.pallas_call(
        functools.partial(_gram_kernel, inv_n=1.0 / n, tm=tm),
        out_shape=jax.ShapeDtypeStruct((bc_pad, bc_pad), jnp.float32),
        grid=grid,
        in_specs=[pl.BlockSpec((bc_pad, tk), lambda i, k: (0, k))],   # feature slab
        out_specs=pl.BlockSpec((tm, bc_pad), lambda i, k: (i, 0)),    # resident rows
        compiler_params=_compiler_params(vmem_limit),
    )(feats)
    return g_pad[:bc, :bc], g_pad


def gram_mse_pallas(x, target_gram_pad):
    """Returns (gram(x)[BC,BC], mse(gram(x), target)) in one Pallas call."""
    feats, bc, bc_pad, hw_pad, tm, tk, n, vmem_limit = _prep(x)
    assert target_gram_pad.shape == (bc_pad, bc_pad), (
        "target gram padding does not match input shape")
    grid = (bc_pad // tm, hw_pad // tk)
    g_pad, partials = pl.pallas_call(
        functools.partial(_gram_mse_kernel, inv_n=1.0 / n, tm=tm),
        out_shape=(
            jax.ShapeDtypeStruct((bc_pad, bc_pad), jnp.float32),
            jax.ShapeDtypeStruct((grid[0], bc_pad), jnp.float32),
        ),
        grid=grid,
        in_specs=[
            pl.BlockSpec((bc_pad, tk), lambda i, k: (0, k)),    # feature slab (rhs+lhs)
            pl.BlockSpec((tm, bc_pad), lambda i, k: (i, 0)),    # target (resident over k)
        ],
        out_specs=(
            pl.BlockSpec((tm, bc_pad), lambda i, k: (i, 0)),    # gram rows (accumulator)
            pl.BlockSpec((1, bc_pad), lambda i, k: (i, 0)),     # lane-dense loss partials
        ),
        compiler_params=_compiler_params(vmem_limit),
    )(feats, target_gram_pad)
    # Padded rows/cols are zero in both G and target -> contribute 0.
    loss = jnp.sum(partials) / float(bc * bc)
    return g_pad[:bc, :bc], loss


class StyleLoss:
    """JAX/Pallas analogue of the PyTorch StyleLoss module."""

    def __init__(self, target_feature):
        target, target_pad = gram_pallas(target_feature)
        self.target = jax.lax.stop_gradient(target)            # detached constant
        self._target_pad = jax.lax.stop_gradient(target_pad)   # padded, kernel input
        self.loss = None

    def __call__(self, x):
        _, self.loss = gram_mse_pallas(x, self._target_pad)
        return x  # forward returns its input unchanged, like the nn.Module


# ----------------------------------------------------------------------------
# Demo / smoke test
# ----------------------------------------------------------------------------
if __name__ == "__main__":
    key = jax.random.PRNGKey(0)
    k_t, k_x = jax.random.split(key)

    B, C, H, W = 2, 4, 16, 16  # NCHW (B*C=8 -> padded to 128; H*W=256)
    target_feature = jax.random.normal(k_t, (B, C, H, W), dtype=jnp.float32)
    x = jax.random.normal(k_x, (B, C, H, W), dtype=jnp.float32)

    module = StyleLoss(target_feature)
    out = module(x)
    out = jax.block_until_ready(out)
    loss = jax.block_until_ready(module.loss)

    # Reference check in plain JAX (same math as the PyTorch gram + mse_loss).
    def gram_ref(t):
        b, c, h, w = t.shape
        f = t.reshape(b * c, h * w)
        return (f @ f.T) / (b * c * h * w)

    G_ref = gram_ref(x)
    T_ref = gram_ref(target_feature)
    loss_ref = jnp.mean((G_ref - T_ref) ** 2)

    G_kernel, loss2 = gram_mse_pallas(x, module._target_pad)
    G_kernel = jax.block_until_ready(G_kernel)

    assert out.shape == x.shape and jnp.allclose(out, x)
    assert jnp.allclose(module.target, T_ref, rtol=1e-5, atol=1e-6)
    assert jnp.allclose(G_kernel, G_ref, rtol=1e-5, atol=1e-6)
    assert jnp.allclose(loss, loss_ref, rtol=1e-5, atol=1e-6)
    assert jnp.allclose(loss2, loss_ref, rtol=1e-5, atol=1e-6)

    print("KERNEL_OK")
</pallas_src>

<mosaic_0001>
module attributes {stable_mosaic.version = 11 : i64} {
  func.func @_gram_kernel(%arg0: i32, %arg1: i32, %arg2: memref<128x256xf32, #tpu.memory_space<vmem>>, %arg3: memref<128x128xf32, #tpu.memory_space<vmem>>) attributes {dimension_semantics = [#tpu.dimension_semantics<parallel>, #tpu.dimension_semantics<arbitrary>], iteration_bounds = array<i64: 1, 1>, scalar_prefetch = 0 : i64, scratch_operands = 0 : i64, tpu.core_type = #tpu.core_type<tc>, window_params = [{transform_indices = @transform_0, window_bounds = array<i64: 128, 256>}, {transform_indices = @transform_1, window_bounds = array<i64: 128, 128>}]} {
    %c0_i32 = arith.constant 0 : i32
    %0 = arith.cmpi eq, %arg1, %c0_i32 : i32
    %1 = arith.extui %0 : i1 to i32
    %c0_i32_0 = arith.constant 0 : i32
    %2 = arith.cmpi ne, %1, %c0_i32_0 : i32
    scf.if %2 {
      %cst_9 = arith.constant 0.000000e+00 : f32
      %15 = vector.broadcast %cst_9 : f32 to vector<128x128xf32>
      %c0_10 = arith.constant 0 : index
      %c0_11 = arith.constant 0 : index
      %16 = vector.load %arg3[%c0_10, %c0_11] : memref<128x128xf32, #tpu.memory_space<vmem>>, vector<128x128xf32>
      tpu.vector_store %arg3[%c0_10, %c0_11], %15 {strides = array<i32>} : memref<128x128xf32, #tpu.memory_space<vmem>>, vector<128x128xf32>,
    } else {
    }
    %c128_i32 = arith.constant 128 : i32
    %3 = arith.muli %arg0, %c128_i32 : i32
    %4 = tpu.assume_multiple %3, 128 : i32
    %5 = arith.index_cast %4 : i32 to index
    %c0 = arith.constant 0 : index
    %6 = vector.load %arg2[%5, %c0] : memref<128x256xf32, #tpu.memory_space<vmem>>, vector<128x256xf32>
    %c0_1 = arith.constant 0 : index
    %c0_2 = arith.constant 0 : index
    %7 = vector.load %arg3[%c0_1, %c0_2] : memref<128x128xf32, #tpu.memory_space<vmem>>, vector<128x128xf32>
    %c0_3 = arith.constant 0 : index
    %c0_4 = arith.constant 0 : index
    %8 = vector.load %arg2[%c0_3, %c0_4] : memref<128x256xf32, #tpu.memory_space<vmem>>, vector<128x256xf32>
    %cst = arith.constant dense<0.000000e+00> : vector<128x128xf32>
    %9 = tpu.matmul %6, %8, %cst {dimension_numbers = #tpu.dot_dimension_numbers<[1], [1], [0], [0], [0, 0, 1, 0], [], []>} : vector<128x256xf32>, vector<128x256xf32>, vector<128x128xf32> -> vector<128x128xf32>
    %10 = arith.addf %7, %9 : vector<128x128xf32>
    %c0_5 = arith.constant 0 : index
    %c0_6 = arith.constant 0 : index
    %11 = vector.load %arg3[%c0_5, %c0_6] : memref<128x128xf32, #tpu.memory_space<vmem>>, vector<128x128xf32>
    tpu.vector_store %arg3[%c0_5, %c0_6], %10 {strides = array<i32>} : memref<128x128xf32, #tpu.memory_space<vmem>>, vector<128x128xf32>,
    %c0_i32_7 = arith.constant 0 : i32
    %12 = arith.cmpi eq, %arg1, %c0_i32_7 : i32
    %13 = arith.extui %12 : i1 to i32
    %c0_i32_8 = arith.constant 0 : i32
    %14 = arith.cmpi ne, %13, %c0_i32_8 : i32
    scf.if %14 {
      %c0_9 = arith.constant 0 : index
      %c0_10 = arith.constant 0 : index
      %15 = vector.load %arg3[%c0_9, %c0_10] : memref<128x128xf32, #tpu.memory_space<vmem>>, vector<128x128xf32>
      %cst_11 = arith.constant 4.8828125E-4 : f32
      %16 = vector.broadcast %cst_11 : f32 to vector<128x128xf32>
      %17 = arith.mulf %15, %16 : vector<128x128xf32>
      %c0_12 = arith.constant 0 : index
      %c0_13 = arith.constant 0 : index
      %18 = vector.load %arg3[%c0_12, %c0_13] : memref<128x128xf32, #tpu.memory_space<vmem>>, vector<128x128xf32>
      tpu.vector_store %arg3[%c0_12, %c0_13], %17 {strides = array<i32>} : memref<128x128xf32, #tpu.memory_space<vmem>>, vector<128x128xf32>,
    } else {
    }
    return
  }
  func.func @transform_0(%arg0: i32, %arg1: i32) -> (i32, i32) {
    %c0_i32 = arith.constant 0 : i32
    %c0_i32_0 = arith.constant 0 : i32
    return %c0_i32, %arg1 : i32, i32
  }
  func.func @transform_1(%arg0: i32, %arg1: i32) -> (i32, i32) {
    %c0_i32 = arith.constant 0 : i32
    %c0_i32_0 = arith.constant 0 : i32
    return %arg0, %c0_i32 : i32, i32
  }
}

</mosaic_0001>

<bundles_post_ra>
// kernel: tpu_custom_call.1
= control target key start
LH: loop header
LB: loop body
LE: loop exit
PB: predicated region body
PF: predicated region fallthrough
CT: control target
= control target key end

     0   :  { %6 = vsyncpa [#allocation3], 0  ;;  %s561_s0 = inlined_call_operand.hbm [shape: f32[128,256], index: 0, kind: input, shape index: {}]   ;;  %s562_s1 = inlined_call_operand.hbm [shape: f32[128,128], index: 1, kind: output, shape index: {}]  }
   0x1   :  { %7 = vsyncpa [#allocation4], 0  ;;  %s459_s6 = smov [#allocation2]  }
   0x2   :  { %s13_s7 = sshll.u32 %s459_s6, 4  ;;  %s14_s7 = int_to_ptr.vmem [resolvable:$true] %s13_s7 }
   0x3   :  { %s423_s8 = scalar_lea.vmem %s14_s7, 4096  ;;  %p428_p1 = scmp.lt.s32.totalorder %s14_s7, %s14_s7 }
   0x4   :  { %p424_p0 = scmp.ne.s32.totalorder %s14_s7, %s423_s8  ;;  %p429_p2 = scmp.lt.s32.totalorder %s423_s8, %s423_s8 }
   0x6   :  { %p430_p3 = por %p429_p2, %p428_p1 }
   0x8   :  { %p431_p4 = pnand %p430_p3, %p424_p0 }
   0xa   :  { %434 = shalt.err (!%p431_p4)
}
   0xb   :  { %s460_s9 = smov 256   ;;  %s461_s10 = smov 16  }
   0xc   :  { %19 = dma.hbm_to_vmem [thread:$0]  %s561_s0, 4096, %s14_s7, [#allocation3], %s460_s9, %s460_s9, %s461_s10  }
   0xd   :  { %455 = dma.done.wait [#allocation3], 4096  }
   0xe   :  { %456 = vsyncadd [#allocation3], 4294963200  ;;  %v478_v0 = vld [vmem:[#allocation2 + $0xf8] sm:$0xff]  ;;  %v480_v1 = vld [vmem:[#allocation2 + $0xf0] sm:$0xff]  ;;  %s462_s0 = smov [#allocation5]  }
   0xf   :  { %v482_v2 = vld [vmem:[#allocation2 + $0xe8] sm:$0xff]  ;;  %129 = vmatprep.subr.mxu0 %v478_v0  ;;  %376 = vmatprep.subr.mxu1 %v478_v0  ;;  %v490_v3 = vld [vmem:[#allocation2 + $0xe0] sm:$0xff]  ;;  %v492_v4 = vld [vmem:[#allocation2 + $0xd8] sm:$0xff]  ;;  %s362_s13 = sshll.u32 %s462_s0, 4  ;;  %s363_s13 = int_to_ptr.vmem [resolvable:$true] %s362_s13 }
  0x10   :  { %130 = vmatpush1.xpose.msra.mxu0 %v480_v1  ;;  %392 = vmatpush1.xpose.msra.mxu1 %v480_v1  ;;  %v114_v5 = vld [vmem:[#allocation2 + $0x88] sm:$0xff]  ;;  %v498_v6 = vld [vmem:[#allocation2 + $0xd0] sm:$0xff]  ;;  %v506_v8 = vld [vmem:[#allocation2 + $0xc0] sm:$0xff]  ;;  %s435_s14 = scalar_lea.vmem %s363_s13, 2048  ;;  %p440_p6 = scmp.lt.s32.totalorder %s363_s13, %s363_s13 }
  0x11   :  { %131 = vmatprep.subr.mxu0 %v482_v2  ;;  %377 = vmatprep.subr.mxu1 %v482_v2  ;;  %v500_v7 = vld [vmem:[#allocation2 + $0xc8] sm:$0xff]  ;;  %v510_v10 = vld [vmem:[#allocation2 + $0xb8] sm:$0xff]  ;;  %v517_v11 = vld [vmem:[#allocation2 + $0xb0] sm:$0xff]  ;;  %p436_p5 = scmp.ne.s32.totalorder %s363_s13, %s435_s14  ;;  %p441_p7 = scmp.lt.s32.totalorder %s435_s14, %s435_s14 }
  0x12   :  { %233 = vmatprep.mubr.f32.mxu1 %v114_v5  ;;  %v508_v9 = vld [vmem:[#allocation2 + $0x8] sm:$0xff]  ;;  %v525_v13 = vld [vmem:[#allocation2 + $0xa0] sm:$0xff]  ;;  %v116_v14 = vld [vmem:[#allocation2 + $0x98] sm:$0xff] }
  0x13   :  { %193 = vmatprep.mubr.f32.mxu0 %v508_v9  ;;  %v519_v12 = vld [vmem:[#allocation2 + $0xa8] sm:$0xff]  ;;  %v115_v15 = vld [vmem:[#allocation2 + $0x90] sm:$0xff]  ;;  %v113_v16 = vld [vmem:[#allocation2 + $0x80] sm:$0xff]  ;;  %p442_p8 = por %p441_p7, %p440_p6 }
  0x14   :  { %132 = vmatpush1.xpose.msra.mxu0 %v490_v3  ;;  %393 = vmatpush1.xpose.msra.mxu1 %v490_v3  ;;  %v529_v17 = vld [vmem:[#allocation2 + $0x78] sm:$0xff]  ;;  %v533_v18 = vld [vmem:[#allocation2 + $0x70] sm:$0xff]  ;;  %v535_v19 = vld [vmem:[#allocation2 + $0x68] sm:$0xff] }
  0x15   :  { %133 = vmatprep.subr.mxu0 %v492_v4  ;;  %378 = vmatprep.subr.mxu1 %v492_v4  ;;  %v109_v20 = vld [vmem:[#allocation2 + $0x60] sm:$0xff]  ;;  %v108_v21 = vld [vmem:[#allocation2 + $0x58] sm:$0xff]  ;;  %v107_v22 = vld [vmem:[#allocation2 + $0x50] sm:$0xff]  ;;  %p443_p9 = pnand %p442_p8, %p436_p5 }
  0x16   :  { %v106_v23 = vld [vmem:[#allocation2 + $0x48] sm:$0xff]  ;;  %v105_v24 = vld [vmem:[#allocation2 + $0x40] sm:$0xff]  ;;  %v104_v25 = vld [vmem:[#allocation2 + $0x38] sm:$0xff] }
  0x17   :  { %v103_v26 = vld [vmem:[#allocation2 + $0x30] sm:$0xff]  ;;  %v102_v27 = vld [vmem:[#allocation2 + $0x28] sm:$0xff]  ;;  %v101_v28 = vld [vmem:[#allocation2 + $0x20] sm:$0xff] }
  0x18   :  { %134 = vmatpush1.xpose.msra.mxu0 %v498_v6  ;;  %394 = vmatpush1.xpose.msra.mxu1 %v498_v6  ;;  %v100_v29 = vld [vmem:[#allocation2 + $0x18] sm:$0xff]  ;;  %v99_v30 = vld [vmem:[#allocation2 + $0x10] sm:$0xff]  ;;  %v97_v31 = vld [vmem:[#allocation2] sm:$0xff] }
  0x19   :  { %135 = vmatprep.subr.mxu0 %v500_v7  ;;  %379 = vmatprep.subr.mxu1 %v500_v7 }
  0x1c   :  { %136 = vmatpush1.xpose.msra.mxu0 %v506_v8  ;;  %395 = vmatpush1.xpose.msra.mxu1 %v506_v8 }
  0x1d   :  { %137 = vmatprep.subr.mxu0 %v510_v10  ;;  %380 = vmatprep.subr.mxu1 %v510_v10 }
  0x20   :  { %138 = vmatpush1.xpose.msra.mxu0 %v517_v11  ;;  %396 = vmatpush1.xpose.msra.mxu1 %v517_v11 }
  0x21   :  { %139 = vmatprep.subr.mxu0 %v519_v12  ;;  %381 = vmatprep.subr.mxu1 %v519_v12 }
  0x24   :  { %140 = vmatpush1.xpose.msra.mxu0 %v525_v13  ;;  %397 = vmatpush1.xpose.msra.mxu1 %v525_v13 }
  0x25   :  { %141 = vmatprep.subr.mxu0 %v116_v14  ;;  %382 = vmatprep.subr.mxu1 %v116_v14 }
  0x28   :  { %142 = vmatpush1.xpose.msra.mxu0 %v115_v15  ;;  %398 = vmatpush1.xpose.msra.mxu1 %v115_v15 }
  0x29   :  { %143 = vmatprep.subr.mxu0 %v114_v5  ;;  %383 = vmatprep.subr.mxu1 %v114_v5 }
  0x2c   :  { %144 = vmatpush1.xpose.msra.mxu0 %v113_v16  ;;  %399 = vmatpush1.xpose.msra.mxu1 %v113_v16 }
  0x2d   :  { %145 = vmatprep.subr.mxu0 %v529_v17  ;;  %384 = vmatprep.subr.mxu1 %v529_v17 }
  0x30   :  { %146 = vmatpush1.xpose.msra.mxu0 %v533_v18  ;;  %400 = vmatpush1.xpose.msra.mxu1 %v533_v18 }
  0x31   :  { %147 = vmatprep.subr.mxu0 %v535_v19  ;;  %385 = vmatprep.subr.mxu1 %v535_v19 }
  0x34   :  { %148 = vmatpush1.xpose.msra.mxu0 %v109_v20  ;;  %401 = vmatpush1.xpose.msra.mxu1 %v109_v20 }
  0x35   :  { %149 = vmatprep.subr.mxu0 %v108_v21  ;;  %386 = vmatprep.subr.mxu1 %v108_v21 }
  0x38   :  { %150 = vmatpush1.xpose.msra.mxu0 %v107_v22  ;;  %402 = vmatpush1.xpose.msra.mxu1 %v107_v22 }
  0x39   :  { %151 = vmatprep.subr.mxu0 %v106_v23  ;;  %387 = vmatprep.subr.mxu1 %v106_v23 }
  0x3c   :  { %152 = vmatpush1.xpose.msra.mxu0 %v105_v24  ;;  %403 = vmatpush1.xpose.msra.mxu1 %v105_v24 }
  0x3d   :  { %153 = vmatprep.subr.mxu0 %v104_v25  ;;  %388 = vmatprep.subr.mxu1 %v104_v25 }
  0x40   :  { %154 = vmatpush1.xpose.msra.mxu0 %v103_v26  ;;  %404 = vmatpush1.xpose.msra.mxu1 %v103_v26 }
  0x41   :  { %155 = vmatprep.subr.mxu0 %v102_v27  ;;  %389 = vmatprep.subr.mxu1 %v102_v27 }
  0x44   :  { %156 = vmatpush1.xpose.msra.mxu0 %v101_v28  ;;  %405 = vmatpush1.xpose.msra.mxu1 %v101_v28 }
  0x45   :  { %157 = vmatprep.subr.mxu0 %v100_v29  ;;  %390 = vmatprep.subr.mxu1 %v100_v29 }
  0x48   :  { %158 = vmatpush1.xpose.msra.mxu0 %v99_v30  ;;  %406 = vmatpush1.xpose.msra.mxu1 %v99_v30 }
  0x49   :  { %159 = vmatprep.subr.mxu0 %v508_v9  ;;  %391 = vmatprep.subr.mxu1 %v508_v9 }
  0x4c   :  { %160 = vmatpush1.xpose.msra.mxu0 %v97_v31  ;;  %407 = vmatpush1.xpose.msra.mxu1 %v97_v31 }
  0x4f   :  { %194 = vmatmul.mubr.f32.vlgmr.msra.gmra.mxu0 %v97_v31  ;;  %234 = vmatmul.mubr.f32.vlgmr.msra.gmra.mxu1 %v113_v16 }
  0x50   :  { %198 = vmatprep.mubr.f32.mxu0 %v100_v29  ;;  %238 = vmatprep.mubr.f32.mxu1 %v116_v14 }
  0x53   :  { %199 = vmatmul.mubr.f32.gmra.mxu0 %v99_v30  ;;  %239 = vmatmul.mubr.f32.gmra.mxu1 %v115_v15 }
  0x54   :  { %203 = vmatprep.mubr.f32.mxu0 %v102_v27  ;;  %243 = vmatprep.mubr.f32.mxu1 %v519_v12 }
  0x57   :  { %204 = vmatmul.mubr.f32.gmra.mxu0 %v101_v28  ;;  %244 = vmatmul.mubr.f32.gmra.mxu1 %v525_v13 }
  0x58   :  { %208 = vmatprep.mubr.f32.mxu0 %v104_v25  ;;  %248 = vmatprep.mubr.f32.mxu1 %v510_v10 }
  0x5b   :  { %209 = vmatmul.mubr.f32.gmra.mxu0 %v103_v26  ;;  %249 = vmatmul.mubr.f32.gmra.mxu1 %v517_v11 }
  0x5c   :  { %213 = vmatprep.mubr.f32.mxu0 %v106_v23  ;;  %253 = vmatprep.mubr.f32.mxu1 %v500_v7 }
  0x5f   :  { %214 = vmatmul.mubr.f32.gmra.mxu0 %v105_v24  ;;  %254 = vmatmul.mubr.f32.gmra.mxu1 %v506_v8 }
  0x60   :  { %218 = vmatprep.mubr.f32.mxu0 %v108_v21  ;;  %258 = vmatprep.mubr.f32.mxu1 %v492_v4 }
  0x63   :  { %219 = vmatmul.mubr.f32.gmra.mxu0 %v107_v22  ;;  %259 = vmatmul.mubr.f32.gmra.mxu1 %v498_v6 }
  0x64   :  { %223 = vmatprep.mubr.f32.mxu0 %v535_v19  ;;  %263 = vmatprep.mubr.f32.mxu1 %v482_v2 }
  0x67   :  { %224 = vmatmul.mubr.f32.gmra.mxu0 %v109_v20  ;;  %264 = vmatmul.mubr.f32.gmra.mxu1 %v490_v3 }
  0x68   :  { %228 = vmatprep.mubr.f32.mxu0 %v529_v17  ;;  %268 = vmatprep.mubr.f32.mxu1 %v478_v0 }
  0x6b   :  { %229 = vmatmul.mubr.f32.gmra.mxu0 %v533_v18  ;;  %269 = vmatmul.mubr.f32.gmra.mxu1 %v480_v1 }
 0x10f   :  { %v195_v32 = vpop.f32.mrf.mxu0  ;;  %v235_v33 = vpop.f32.mrf.mxu1 }
 0x110   :  { %v325_v36 = vmul.f32 0.00048828125, %v195_v32  ;;  %v333_v37 = vmul.f32 0.00048828125, %v235_v33 }
 0x111   :  { %v197_v34 = vpop.f32.mrf.mxu0  ;;  %v237_v35 = vpop.f32.mrf.mxu1 }
 0x112   :  { %341 = vst [vmem:[#allocation5] sm:$0xff] %v325_v36  ;;  %349 = vst [vmem:[#allocation5 + $0x40] sm:$0xff] %v333_v37 }
 0x113   :  { %v200_v38 = vpop.f32.mrf.mxu0  ;;  %v240_v39 = vpop.f32.mrf.mxu1 }
 0x114   :  { %v326_v42 = vmul.f32 0.00048828125, %v200_v38  ;;  %v334_v43 = vmul.f32 0.00048828125, %v240_v39 }
 0x115   :  { %v202_v40 = vpop.f32.mrf.mxu0  ;;  %v242_v41 = vpop.f32.mrf.mxu1 }
 0x116   :  { %342 = vst [vmem:[#allocation5 + $0x8] sm:$0xff] %v326_v42  ;;  %350 = vst [vmem:[#allocation5 + $0x48] sm:$0xff] %v334_v43 }
 0x117   :  { %v205_v44 = vpop.f32.mrf.mxu0  ;;  %v245_v45 = vpop.f32.mrf.mxu1 }
 0x118   :  { %v327_v48 = vmul.f32 0.00048828125, %v205_v44  ;;  %v335_v49 = vmul.f32 0.00048828125, %v245_v45 }
 0x119   :  { %v207_v46 = vpop.f32.mrf.mxu0  ;;  %v247_v47 = vpop.f32.mrf.mxu1 }
 0x11a   :  { %343 = vst [vmem:[#allocation5 + $0x10] sm:$0xff] %v327_v48  ;;  %351 = vst [vmem:[#allocation5 + $0x50] sm:$0xff] %v335_v49 }
 0x11b   :  { %v210_v50 = vpop.f32.mrf.mxu0  ;;  %v250_v51 = vpop.f32.mrf.mxu1 }
 0x11c   :  { %v328_v54 = vmul.f32 0.00048828125, %v210_v50  ;;  %v336_v55 = vmul.f32 0.00048828125, %v250_v51 }
 0x11d   :  { %v212_v52 = vpop.f32.mrf.mxu0  ;;  %v252_v53 = vpop.f32.mrf.mxu1 }
 0x11e   :  { %344 = vst [vmem:[#allocation5 + $0x18] sm:$0xff] %v328_v54  ;;  %352 = vst [vmem:[#allocation5 + $0x58] sm:$0xff] %v336_v55 }
 0x11f   :  { %v215_v56 = vpop.f32.mrf.mxu0  ;;  %v255_v57 = vpop.f32.mrf.mxu1 }
 0x120   :  { %v329_v60 = vmul.f32 0.00048828125, %v215_v56  ;;  %v337_v61 = vmul.f32 0.00048828125, %v255_v57 }
 0x121   :  { %v217_v58 = vpop.f32.mrf.mxu0  ;;  %v257_v59 = vpop.f32.mrf.mxu1 }
 0x122   :  { %345 = vst [vmem:[#allocation5 + $0x20] sm:$0xff] %v329_v60  ;;  %353 = vst [vmem:[#allocation5 + $0x60] sm:$0xff] %v337_v61 }
 0x123   :  { %v220_v62 = vpop.f32.mrf.mxu0  ;;  %v260_v63 = vpop.f32.mrf.mxu1 }
 0x124   :  { %v330_v2 = vmul.f32 0.00048828125, %v220_v62  ;;  %v338_v3 = vmul.f32 0.00048828125, %v260_v63 }
 0x125   :  { %v222_v0 = vpop.f32.mrf.mxu0  ;;  %v262_v1 = vpop.f32.mrf.mxu1 }
 0x126   :  { %346 = vst [vmem:[#allocation5 + $0x28] sm:$0xff] %v330_v2  ;;  %354 = vst [vmem:[#allocation5 + $0x68] sm:$0xff] %v338_v3 }
 0x127   :  { %v225_v4 = vpop.f32.mrf.mxu0  ;;  %v265_v5 = vpop.f32.mrf.mxu1 }
 0x128   :  { %v331_v8 = vmul.f32 0.00048828125, %v225_v4  ;;  %v339_v9 = vmul.f32 0.00048828125, %v265_v5 }
 0x129   :  { %v227_v6 = vpop.f32.mrf.mxu0  ;;  %v267_v7 = vpop.f32.mrf.mxu1 }
 0x12a   :  { %347 = vst [vmem:[#allocation5 + $0x30] sm:$0xff] %v331_v8  ;;  %355 = vst [vmem:[#allocation5 + $0x70] sm:$0xff] %v339_v9 }
 0x12b   :  { %v230_v10 = vpop.f32.mrf.mxu0  ;;  %v270_v11 = vpop.f32.mrf.mxu1 }
 0x12c   :  { %v332_v14 = vmul.f32 0.00048828125, %v230_v10  ;;  %v340_v15 = vmul.f32 0.00048828125, %v270_v11 }
 0x12d   :  { %v232_v12 = vpop.f32.mrf.mxu0  ;;  %v272_v13 = vpop.f32.mrf.mxu1 }
 0x12e   :  { %348 = vst [vmem:[#allocation5 + $0x38] sm:$0xff] %v332_v14  ;;  %356 = vst [vmem:[#allocation5 + $0x78] sm:$0xff] %v340_v15 }
 0x12f   :  { %446 = shalt.err (!%p443_p9)
}
 0x130   :  { %s463_s15 = smov 128   ;;  %s464_s16 = smov 8  }
 0x131   :  { %368 = dma.vmem_to_hbm [thread:$0]  %s363_s13, 2048, %s562_s1, [#allocation4], %s463_s15, %s463_s15, %s464_s16  }
 0x132   :  { %457 = dma.done.wait [#allocation4], 2048  }
 0x133   :  { %458 = vsyncadd [#allocation4], 4294965248 }
 0x134   :  { %372 = vsyncpa [#allocation3], 1 }
 0x135   :  { %373 = vsyncpa [#allocation4], 1 }

</bundles_post_ra>
